<compile_context>
chip_gen: v5e
topology: v5e:2x2
jax: 0.10.0
libtpu: 0.0.40
codegen_flags: <defaults>
</compile_context>

<pallas_src>
import jax
import jax.numpy as jnp
from jax.experimental import pallas as pl
from jax.experimental.pallas import tpu as pltpu

_LANE = 128
_SUBLANE = 8
_PAD_UNIT = _SUBLANE * _LANE          # 1024 elems keeps any 2-D view (8,128)-aligned
_SMALL_BYTES = 4 * 1024 * 1024        # <= this: single whole-array VMEM block


def _toy_kernel(params_ref, x_ref, o_ref):
    # params_ref lives in SMEM: [a, c] with a = w1*w2, c = b1*w2 + b2 + toy.
    a = params_ref[0]
    c = params_ref[1]
    o_ref[...] = x_ref[...] * a + c


def _target_block_bytes():
    """Bytes of f32 per grid step, sized per TPU generation so the 4x
    double-buffered in+out footprint stays under the default scoped VMEM."""
    try:
        kind = jax.devices()[0].device_kind.lower()
    except Exception:
        kind = ""
    if "v5" in kind:
        return 2 * 1024 * 1024        # v5e: 16 MiB scoped VMEM -> 4 x 2 MiB = 8 MiB
    return 4 * 1024 * 1024            # v6e/v7x: 32 MiB scoped VMEM -> 4 x 4 MiB = 16 MiB


def _pick_layout(n_padded):
    """Lane-dense (rows, cols) view; n_padded is a multiple of 1024."""
    for cols in (1024, 512, 256, 128):
        if n_padded % cols == 0 and n_padded // cols >= _SUBLANE:
            return n_padded // cols, cols
    return n_padded // _LANE, _LANE


def _block_rows(rows, cols):
    """Rows per grid step: ~target bytes, multiple of 8, even trip count."""
    itemsize = 4
    br = max((_target_block_bytes() // (cols * itemsize)) // _SUBLANE * _SUBLANE,
             _SUBLANE)
    br = min(br, rows)
    nb = pl.cdiv(rows, br)
    if nb >= 2 and nb % 2 == 1:
        # Even trip count so both v7x TensorCores get equal work.
        nb += 1
        br = min(((pl.cdiv(rows, nb) + _SUBLANE - 1) // _SUBLANE) * _SUBLANE, rows)
    return br


def toy_model_forward(x, w1, b1, w2, b2, toy_val, *, donate_input=False):
    """x: (N, 1, H, W) float32. Returns (N, 1, H, W) float32."""
    # Fold conv1, conv2 (both 1x1, 1->1 channel) and the toy scalar into one
    # affine map; scalar math is done once outside the kernel.
    a = (w1 * w2).astype(jnp.float32)
    c = (b1 * w2 + b2 + toy_val).astype(jnp.float32)
    params = jnp.stack([a, c])        # shape (2,), lives in SMEM

    orig_shape = x.shape
    n = x.size
    n_pad = ((n + _PAD_UNIT - 1) // _PAD_UNIT) * _PAD_UNIT
    x_flat = x.reshape(-1)
    if n_pad != n:
        # Ragged element counts get zero-padded to an (8,128)-aligned size so
        # stores stay unmasked and the tiled path stays available; the tail is
        # sliced off after the kernel.
        x_flat = jnp.pad(x_flat, (0, n_pad - n))
    rows, cols = _pick_layout(n_pad)
    x2 = x_flat.reshape(rows, cols)

    smem_spec = pl.BlockSpec(memory_space=pltpu.MemorySpace.SMEM)
    cost = pl.CostEstimate(flops=2 * n_pad, transcendentals=0,
                           bytes_accessed=8 * n_pad)
    aliases = {1: 0} if donate_input else {}

    if n_pad * 4 > _SMALL_BYTES:
        # Streaming path: cdiv row-tiled grid (Pallas handles the ragged last
        # block), double-buffered DMA, megacore-parallel grid axis.
        br = _block_rows(rows, cols)
        out2 = pl.pallas_call(
            _toy_kernel,
            out_shape=jax.ShapeDtypeStruct((rows, cols), x.dtype),
            grid=(pl.cdiv(rows, br),),
            in_specs=[
                smem_spec,
                pl.BlockSpec((br, cols), lambda i: (i, 0)),
            ],
            out_specs=pl.BlockSpec((br, cols), lambda i: (i, 0)),
            compiler_params=pltpu.CompilerParams(
                dimension_semantics=("parallel",)),
            cost_estimate=cost,
            input_output_aliases=aliases,
        )(params, x2)
    else:
        # Small-input path: whole array as one VMEM-resident block, no grid.
        out2 = pl.pallas_call(
            _toy_kernel,
            out_shape=jax.ShapeDtypeStruct((rows, cols), x.dtype),
            in_specs=[
                smem_spec,
                pl.BlockSpec(memory_space=pltpu.MemorySpace.VMEM),
            ],
            out_specs=pl.BlockSpec(memory_space=pltpu.MemorySpace.VMEM),
            cost_estimate=cost,
            input_output_aliases=aliases,
        )(params, x2)

    out_flat = out2.reshape(-1)
    if n_pad != n:
        out_flat = out_flat[:n]
    return out_flat.reshape(orig_shape)


if __name__ == "__main__":
    key = jax.random.PRNGKey(0)
    k_x, k_w1, k_b1, k_w2, k_b2, k_big = jax.random.split(key, 6)

    # Deterministic parameter init (Conv2d(1,1,1) has scalar weight & bias).
    w1 = jax.random.normal(k_w1, (), dtype=jnp.float32)
    b1 = jax.random.normal(k_b1, (), dtype=jnp.float32)
    w2 = jax.random.normal(k_w2, (), dtype=jnp.float32)
    b2 = jax.random.normal(k_b2, (), dtype=jnp.float32)

    # TODO(synk): original Toy.toy_func() returns random.randint(0, 1000);
    # fixed to a deterministic value here for reproducibility.
    toy_val = jnp.float32(42.0)

    def ref_fn(t):
        return (t * w1 + b1) * w2 + b2 + toy_val

    # Small shape consistent with Conv2d(1, 1, 1): N=2, C=1, H=W=16.
    x = jax.random.normal(k_x, (2, 1, 16, 16), dtype=jnp.float32)
    out = jax.block_until_ready(toy_model_forward(x, w1, b1, w2, b2, toy_val))
    assert out.shape == x.shape
    assert jnp.allclose(out, ref_fn(x), atol=1e-4), "small-path mismatch"

    # Also exercise the streaming path once (padded, ragged, cdiv grid).
    x_big = jax.random.normal(k_big, (3, 1, 1031, 517), dtype=jnp.float32)
    out_big = jax.block_until_ready(
        toy_model_forward(x_big, w1, b1, w2, b2, toy_val))
    assert out_big.shape == x_big.shape
    assert jnp.allclose(out_big, ref_fn(x_big), atol=1e-4), "tiled-path mismatch"

    print("KERNEL_OK")
</pallas_src>

<mosaic_0001>
module attributes {stable_mosaic.version = 11 : i64} {
  func.func @_toy_kernel(%arg0: memref<2xf32, #tpu.memory_space<smem>>, %arg1: memref<8x128xf32, #tpu.memory_space<vmem>>, %arg2: memref<8x128xf32, #tpu.memory_space<vmem>>) attributes {dimension_semantics = [], scalar_prefetch = 0 : i64, scratch_operands = 0 : i64, tpu.core_type = #tpu.core_type<tc>} {
    %c0 = arith.constant 0 : index
    %0 = memref.load %arg0[%c0] : memref<2xf32, #tpu.memory_space<smem>>
    %c1 = arith.constant 1 : index
    %1 = memref.load %arg0[%c1] : memref<2xf32, #tpu.memory_space<smem>>
    %c0_0 = arith.constant 0 : index
    %c0_1 = arith.constant 0 : index
    %2 = vector.load %arg1[%c0_0, %c0_1] : memref<8x128xf32, #tpu.memory_space<vmem>>, vector<8x128xf32>
    %3 = vector.broadcast %0 : f32 to vector<8x128xf32>
    %4 = arith.mulf %2, %3 : vector<8x128xf32>
    %5 = vector.broadcast %1 : f32 to vector<8x128xf32>
    %6 = arith.addf %4, %5 : vector<8x128xf32>
    %c0_2 = arith.constant 0 : index
    %c0_3 = arith.constant 0 : index
    %7 = vector.load %arg2[%c0_2, %c0_3] : memref<8x128xf32, #tpu.memory_space<vmem>>, vector<8x128xf32>
    tpu.vector_store %arg2[%c0_2, %c0_3], %6 {strides = array<i32>} : memref<8x128xf32, #tpu.memory_space<vmem>>, vector<8x128xf32>,
    return
  }
}

</mosaic_0001>

<bundles_post_ra>
// kernel: tpu_custom_call.1
= control target key start
LH: loop header
LB: loop body
LE: loop exit
PB: predicated region body
PF: predicated region fallthrough
CT: control target
= control target key end

     0   :  { %7 = vsyncpa [#allocation5], 0  ;;  %s162_s0 = inlined_call_operand.hbm [shape: f32[2], index: 0, kind: input, shape index: {}]   ;;  %s163_s1 = inlined_call_operand.hbm [shape: f32[8,128], index: 1, kind: input, shape index: {}]   ;;  %s164_s2 = inlined_call_operand.hbm [shape: f32[8,128], index: 2, kind: output, shape index: {}]  }
   0x1   :  { %8 = vsyncpa [#allocation3], 0 }
   0x2   :  { %9 = vsyncpa [#allocation4], 0  ;;  %s15_s11 = sshll.u32 %s162_s0, 4  ;;  %s24_s14 = sshll.u32 %s163_s1, 4  ;;  %s16_s11 = int_to_ptr.hbm [resolvable:$true] %s15_s11  ;;  %s25_s14 = int_to_ptr.hbm [resolvable:$true] %s24_s14 }
   0x3   :  { %s135_s15 = smov [#allocation2]   ;;  %s136_s16 = smov [#allocation6]  }
   0x4   :  { %18 = dma.hbm_to_smem %s16_s11, 16, %s135_s15, [#allocation5]  }
   0x5   :  { %s26_s17 = sshll.u32 %s136_s16, 4  ;;  %s27_s17 = int_to_ptr.vmem [resolvable:$true] %s26_s17 }
   0x6   :  { %29 = dma.hbm_to_vmem [thread:$0]  %s25_s14, 128, %s27_s17, [#allocation3]  }
   0x7   :  { %129 = dma.done.wait [#allocation5], 16  }
   0x8   :  { %130 = vsyncadd [#allocation5], 4294967280 }
   0x9   :  { %131 = dma.done.wait [#allocation3], 128  }
   0xa   :  { %132 = vsyncadd [#allocation3], 4294967168 }
   0xb   :  { %38 = sfence }
   0xc   :  { %s39_s18 = sld [smem:[#allocation2]]  ;;  %v41_v0 = vld [vmem:[#allocation6] sm:$0xff]  ;;  %s137_s0 = smov [#allocation7]  }
   0xd   :  { %s65_s19 = sld [smem:[#allocation2 + $0x1]]  ;;  %s52_s20 = sshll.u32 %s137_s0, 4  ;;  %s53_s20 = int_to_ptr.vmem [resolvable:$true] %s52_s20 }
   0xe   :  { %s54_s22 = sshll.u32 %s164_s2, 4  ;;  %s55_s22 = int_to_ptr.hbm [resolvable:$true] %s54_s22 }
  0x12   :  { %v42_v1 = vstv %s39_s18 }
  0x13   :  { %v43_v2 = vmul.f32 %v42_v1, %v41_v0  ;;  %v44_v3 = vstv %s65_s19 }
  0x15   :  { %v45_v4 = vadd.f32 %v44_v3, %v43_v2 }
  0x17   :  { %46 = vst [vmem:[#allocation7] sm:$0xff] %v45_v4 }
  0x18   :  { %57 = dma.vmem_to_hbm [thread:$0]  %s53_s20, 128, %s55_s22, [#allocation4]  }
  0x19   :  { %133 = dma.done.wait [#allocation4], 128  }
  0x1a   :  { %134 = vsyncadd [#allocation4], 4294967168 }
  0x1b   :  { %62 = vsyncpa [#allocation3], 1 }
  0x1c   :  { %63 = vsyncpa [#allocation4], 1 }
  0x1d   :  { %64 = vsyncpa [#allocation5], 1 }

</bundles_post_ra>
